<compile_context>
chip_gen: v6e
topology: v6e:2x2x1
jax: 0.10.0
libtpu: 0.0.40
codegen_flags: <defaults>
</compile_context>

<pallas_src>
import functools

import jax
import jax.numpy as jnp
from jax import lax
from jax.experimental import pallas as pl
from jax.experimental.pallas import tpu as pltpu


def _ceil_to(x, m):
    return (x + m - 1) // m * m


def _make_convlayer_kernel(num_pool_taps, negative_slope):
    def kernel(a_ref, w_ref, scale_ref, bias_ref, o_ref):
        # a_ref     : (1, P, K_pad, m_tile) bf16  folded conv operand (one pool tap per P)
        # w_ref     : (Cout, K_pad)         bf16  folded conv weight
        # scale_ref : (Cout, 1)             f32   folded BatchNorm scale (eval)
        # bias_ref  : (Cout, 1)             f32   folded BatchNorm bias  (eval)
        # o_ref     : (1, Cout, m_tile)     f32   pooled / normalised output tile
        w = w_ref[...]
        # Conv3d: one (Cout,K)x(K,m_tile) MXU matmul per pooling tap;
        # MaxPool3d: running max kept in vregs (no VMEM accumulator traffic).
        acc = jnp.dot(w, a_ref[0, 0], preferred_element_type=jnp.float32)
        for p in range(1, num_pool_taps):
            acc = jnp.maximum(
                acc, jnp.dot(w, a_ref[0, p], preferred_element_type=jnp.float32))
        y = acc * scale_ref[...] + bias_ref[...]             # BatchNorm3d (eval, folded)
        o_ref[0] = jnp.where(y > 0, y, negative_slope * y)   # (Leaky)ReLU
        # Dropout: identity (inference).
    return kernel


def convlayer_forward(x_ncdhw, weight, bn, kernel_cfg, pooling_cfg,
                      relu_type='leaky', bn_eps=1e-5, m_tile=128):
    """ConvLayer forward.  x: (N, Cin, D, H, W), weight: (Cout, Cin, ck, ck, ck),
    bn = (gamma, beta, running_mean, running_var).  Returns (N, Cout, Dp, Hp, Wp)."""
    ck, sc, cpad = kernel_cfg
    pk, ps, ppad = pooling_cfg
    if ppad != 0:
        raise NotImplementedError("MaxPool3d padding > 0")  # TODO(synk)
    negative_slope = 0.01 if relu_type == 'leaky' else 0.0

    N, Cin, D, H, W = x_ncdhw.shape
    Cout = weight.shape[0]

    x = x_ncdhw.astype(jnp.float32)
    if cpad:
        x = jnp.pad(x, ((0, 0), (0, 0), (cpad, cpad), (cpad, cpad), (cpad, cpad)))
    Dc, Hc, Wc = D + 2 * cpad, H + 2 * cpad, W + 2 * cpad

    # PyTorch Conv3d / MaxPool3d (ceil_mode=False) output extents.
    Do, Ho, Wo = [(e - ck) // sc + 1 for e in (Dc, Hc, Wc)]
    Dp, Hp, Wp = [(e - pk) // ps + 1 for e in (Do, Ho, Wo)]
    assert min(Do, Ho, Wo) > 0 and min(Dp, Hp, Wp) > 0
    Mp = Dp * Hp * Wp
    S = sc * ps                       # pooled-output stride in input coordinates
    P = pk ** 3                       # pooling-window taps
    K = Cin * ck ** 3                 # folded contraction length (~108 for demo)

    K_pad = _ceil_to(K, 16)           # bf16 sublane tile
    M_pad = _ceil_to(Mp, m_tile)      # lane-dense 128-wide output tiles

    # Static in-bounds guard for every strided tap slice (VMEM has no runtime check).
    assert (Dp - 1) * S + (pk - 1) * sc + ck <= Dc
    assert (Hp - 1) * S + (pk - 1) * sc + ck <= Hc
    assert (Wp - 1) * S + (pk - 1) * sc + ck <= Wc

    # ---------- host layout pass: fold conv taps into the contraction dim ----------
    # a[n, p, t*Cin + ci, m] = x[n, ci, dp*S + pd*sc + kd, hp*S + ph*sc + kh,
    #                                    wp*S + pw*sc + kw]
    # with p = (pd,ph,pw) pooling tap, t = (kd,kh,kw) conv tap,
    #      m = dp*Hp*Wp + hp*Wp + wp  (== final output spatial order; no junk rows).
    xb = x.astype(jnp.bfloat16)
    a_pool = []
    for pd in range(pk):
        for ph in range(pk):
            for pw in range(pk):
                cols = []
                for kd in range(ck):
                    for kh in range(ck):
                        for kw in range(ck):
                            d0, h0, w0 = pd * sc + kd, ph * sc + kh, pw * sc + kw
                            patch = xb[:, :,
                                       d0:d0 + (Dp - 1) * S + 1:S,
                                       h0:h0 + (Hp - 1) * S + 1:S,
                                       w0:w0 + (Wp - 1) * S + 1:S]
                            cols.append(patch.reshape(N, Cin, Mp))
                a_pool.append(jnp.concatenate(cols, axis=1))      # (N, K, Mp)
    a = jnp.stack(a_pool, axis=1)                                  # (N, P, K, Mp)
    a = jnp.pad(a, ((0, 0), (0, 0), (0, K_pad - K), (0, M_pad - Mp)))

    # Folded weight, same K ordering (conv-tap-major, channel-minor).
    w = (jnp.transpose(weight, (0, 2, 3, 4, 1)).reshape(Cout, K)
           .astype(jnp.bfloat16))
    w = jnp.pad(w, ((0, 0), (0, K_pad - K)))

    # Folded BatchNorm (eval mode).
    gamma, beta, r_mean, r_var = [jnp.asarray(b, jnp.float32) for b in bn]
    inv_std = 1.0 / jnp.sqrt(r_var + bn_eps)
    bn_scale = (gamma * inv_std).reshape(Cout, 1)
    bn_bias = (beta - r_mean * gamma * inv_std).reshape(Cout, 1)

    kernel = _make_convlayer_kernel(P, negative_slope)
    num_m = M_pad // m_tile
    out = pl.pallas_call(
        kernel,
        out_shape=jax.ShapeDtypeStruct((N, Cout, M_pad), jnp.float32),
        grid=(N, num_m),
        in_specs=[pl.BlockSpec((1, P, K_pad, m_tile), lambda n, m: (n, 0, 0, m)),
                  pl.BlockSpec((Cout, K_pad), lambda n, m: (0, 0)),
                  pl.BlockSpec((Cout, 1), lambda n, m: (0, 0)),
                  pl.BlockSpec((Cout, 1), lambda n, m: (0, 0))],
        out_specs=pl.BlockSpec((1, Cout, m_tile), lambda n, m: (n, 0, m)),
        compiler_params=pltpu.CompilerParams(
            dimension_semantics=("parallel", "parallel"),   # batch x M-tiles
            vmem_limit_bytes=32 * 1024 * 1024),              # per-step ~0.5 MiB used
    )(a, w, bn_scale, bn_bias)

    # Output is already lane-dense and in (N, Cout, M) order: slice M padding,
    # reshape -- no final transpose.
    return out[:, :, :Mp].reshape(N, Cout, Dp, Hp, Wp)


def convlayer_reference(x_ncdhw, weight, bn, kernel_cfg, pooling_cfg,
                        relu_type='leaky', bn_eps=1e-5):
    """Pure-JAX reference (same bf16 operand cast, f32 accumulation)."""
    ck, sc, cpad = kernel_cfg
    pk, ps, ppad = pooling_cfg
    assert ppad == 0
    y = lax.conv_general_dilated(
        x_ncdhw.astype(jnp.bfloat16), weight.astype(jnp.bfloat16),
        window_strides=(sc, sc, sc), padding=[(cpad, cpad)] * 3,
        dimension_numbers=('NCDHW', 'OIDHW', 'NCDHW'),
        preferred_element_type=jnp.float32)
    y = lax.reduce_window(y, jnp.array(-jnp.inf, y.dtype), lax.max,
                          window_dimensions=(1, 1, pk, pk, pk),
                          window_strides=(1, 1, ps, ps, ps), padding='VALID')
    gamma, beta, r_mean, r_var = bn
    scale = gamma / jnp.sqrt(r_var + bn_eps)
    bias = beta - r_mean * scale
    y = y * scale[None, :, None, None, None] + bias[None, :, None, None, None]
    slope = 0.01 if relu_type == 'leaky' else 0.0
    return jnp.where(y > 0, y, slope * y)


if __name__ == "__main__":
    # ConvLayer(in_channels=4, out_channels=16, kernel=(3,1,0), pooling=(2,2,0), drop_rate=0.1)
    in_channels, out_channels = 4, 16
    kernel_cfg = (3, 1, 0)        # (kernel_size, kernel_stride, kernel_padding)
    pooling_cfg = (2, 2, 0)       # (pool_kernel, pool_stride, pool_padding)
    N, D, H, W = 2, 16, 16, 16

    key = jax.random.PRNGKey(0)
    kx, kw, kg, kb, km, kv = jax.random.split(key, 6)
    x = jax.random.normal(kx, (N, in_channels, D, H, W), jnp.float32)
    fan_in = in_channels * kernel_cfg[0] ** 3
    weight = jax.random.normal(
        kw, (out_channels, in_channels) + (kernel_cfg[0],) * 3, jnp.float32
    ) / jnp.sqrt(fan_in)
    bn = (1.0 + 0.1 * jax.random.normal(kg, (out_channels,), jnp.float32),   # gamma
          0.1 * jax.random.normal(kb, (out_channels,), jnp.float32),         # beta
          0.1 * jax.random.normal(km, (out_channels,), jnp.float32),         # running_mean
          1.0 + 0.1 * jax.random.uniform(kv, (out_channels,), jnp.float32))  # running_var

    fwd = jax.jit(functools.partial(convlayer_forward,
                                    kernel_cfg=kernel_cfg, pooling_cfg=pooling_cfg))
    out = jax.block_until_ready(fwd(x, weight, bn))

    Do = (D - kernel_cfg[0]) // kernel_cfg[1] + 1
    Dp = (Do - pooling_cfg[0]) // pooling_cfg[1] + 1
    assert out.shape == (N, out_channels, Dp, Dp, Dp), out.shape
    assert bool(jnp.all(jnp.isfinite(out)))

    ref = convlayer_reference(x, weight, bn, kernel_cfg, pooling_cfg)
    max_err = float(jnp.max(jnp.abs(out - ref)))
    assert max_err < 2e-3, f"max abs err {max_err}"
    print("KERNEL_OK")
</pallas_src>

<mosaic_0001>
module attributes {stable_mosaic.version = 11 : i64} {
  func.func @kernel(%arg0: i32, %arg1: i32, %arg2: memref<1x8x112x128xbf16, #tpu.memory_space<vmem>>, %arg3: memref<16x112xbf16, #tpu.memory_space<vmem>>, %arg4: memref<16x1xf32, #tpu.memory_space<vmem>>, %arg5: memref<16x1xf32, #tpu.memory_space<vmem>>, %arg6: memref<1x16x128xf32, #tpu.memory_space<vmem>>) attributes {dimension_semantics = [#tpu.dimension_semantics<parallel>, #tpu.dimension_semantics<parallel>], iteration_bounds = array<i64: 2, 3>, scalar_prefetch = 0 : i64, scratch_operands = 0 : i64, tpu.core_type = #tpu.core_type<tc>, window_params = [{transform_indices = @transform_0, window_bounds = array<i64: 1, 8, 112, 128>}, {pipeline_mode = #tpu.pipeline_mode<synchronous>, transform_indices = @transform_1, window_bounds = array<i64: 16, 112>}, {pipeline_mode = #tpu.pipeline_mode<synchronous>, transform_indices = @transform_2, window_bounds = array<i64: 16, 1>}, {pipeline_mode = #tpu.pipeline_mode<synchronous>, transform_indices = @transform_3, window_bounds = array<i64: 16, 1>}, {transform_indices = @transform_4, window_bounds = array<i64: 1, 16, 128>}]} {
    %c0 = arith.constant 0 : index
    %c0_0 = arith.constant 0 : index
    %0 = vector.load %arg3[%c0, %c0_0] : memref<16x112xbf16, #tpu.memory_space<vmem>>, vector<16x112xbf16>
    %c0_1 = arith.constant 0 : index
    %c0_2 = arith.constant 0 : index
    %c0_3 = arith.constant 0 : index
    %c0_4 = arith.constant 0 : index
    %1 = vector.load %arg2[%c0_1, %c0_2, %c0_3, %c0_4] : memref<1x8x112x128xbf16, #tpu.memory_space<vmem>>, vector<1x1x112x128xbf16>
    %2 = vector.shape_cast %1 : vector<1x1x112x128xbf16> to vector<112x128xbf16>
    %cst = arith.constant dense<0.000000e+00> : vector<16x128xf32>
    %3 = tpu.matmul %0, %2, %cst {dimension_numbers = #tpu.dot_dimension_numbers<[1], [0], [0], [1], [0, 0, 1, 1], [], []>} : vector<16x112xbf16>, vector<112x128xbf16>, vector<16x128xf32> -> vector<16x128xf32>
    %c0_5 = arith.constant 0 : index
    %c1 = arith.constant 1 : index
    %c0_6 = arith.constant 0 : index
    %c0_7 = arith.constant 0 : index
    %4 = vector.load %arg2[%c0_5, %c1, %c0_6, %c0_7] : memref<1x8x112x128xbf16, #tpu.memory_space<vmem>>, vector<1x1x112x128xbf16>
    %5 = vector.shape_cast %4 : vector<1x1x112x128xbf16> to vector<112x128xbf16>
    %cst_8 = arith.constant dense<0.000000e+00> : vector<16x128xf32>
    %6 = tpu.matmul %0, %5, %cst_8 {dimension_numbers = #tpu.dot_dimension_numbers<[1], [0], [0], [1], [0, 0, 1, 1], [], []>} : vector<16x112xbf16>, vector<112x128xbf16>, vector<16x128xf32> -> vector<16x128xf32>
    %7 = arith.maximumf %3, %6 : vector<16x128xf32>
    %c0_9 = arith.constant 0 : index
    %c2 = arith.constant 2 : index
    %c0_10 = arith.constant 0 : index
    %c0_11 = arith.constant 0 : index
    %8 = vector.load %arg2[%c0_9, %c2, %c0_10, %c0_11] : memref<1x8x112x128xbf16, #tpu.memory_space<vmem>>, vector<1x1x112x128xbf16>
    %9 = vector.shape_cast %8 : vector<1x1x112x128xbf16> to vector<112x128xbf16>
    %cst_12 = arith.constant dense<0.000000e+00> : vector<16x128xf32>
    %10 = tpu.matmul %0, %9, %cst_12 {dimension_numbers = #tpu.dot_dimension_numbers<[1], [0], [0], [1], [0, 0, 1, 1], [], []>} : vector<16x112xbf16>, vector<112x128xbf16>, vector<16x128xf32> -> vector<16x128xf32>
    %11 = arith.maximumf %7, %10 : vector<16x128xf32>
    %c0_13 = arith.constant 0 : index
    %c3 = arith.constant 3 : index
    %c0_14 = arith.constant 0 : index
    %c0_15 = arith.constant 0 : index
    %12 = vector.load %arg2[%c0_13, %c3, %c0_14, %c0_15] : memref<1x8x112x128xbf16, #tpu.memory_space<vmem>>, vector<1x1x112x128xbf16>
    %13 = vector.shape_cast %12 : vector<1x1x112x128xbf16> to vector<112x128xbf16>
    %cst_16 = arith.constant dense<0.000000e+00> : vector<16x128xf32>
    %14 = tpu.matmul %0, %13, %cst_16 {dimension_numbers = #tpu.dot_dimension_numbers<[1], [0], [0], [1], [0, 0, 1, 1], [], []>} : vector<16x112xbf16>, vector<112x128xbf16>, vector<16x128xf32> -> vector<16x128xf32>
    %15 = arith.maximumf %11, %14 : vector<16x128xf32>
    %c0_17 = arith.constant 0 : index
    %c4 = arith.constant 4 : index
    %c0_18 = arith.constant 0 : index
    %c0_19 = arith.constant 0 : index
    %16 = vector.load %arg2[%c0_17, %c4, %c0_18, %c0_19] : memref<1x8x112x128xbf16, #tpu.memory_space<vmem>>, vector<1x1x112x128xbf16>
    %17 = vector.shape_cast %16 : vector<1x1x112x128xbf16> to vector<112x128xbf16>
    %cst_20 = arith.constant dense<0.000000e+00> : vector<16x128xf32>
    %18 = tpu.matmul %0, %17, %cst_20 {dimension_numbers = #tpu.dot_dimension_numbers<[1], [0], [0], [1], [0, 0, 1, 1], [], []>} : vector<16x112xbf16>, vector<112x128xbf16>, vector<16x128xf32> -> vector<16x128xf32>
    %19 = arith.maximumf %15, %18 : vector<16x128xf32>
    %c0_21 = arith.constant 0 : index
    %c5 = arith.constant 5 : index
    %c0_22 = arith.constant 0 : index
    %c0_23 = arith.constant 0 : index
    %20 = vector.load %arg2[%c0_21, %c5, %c0_22, %c0_23] : memref<1x8x112x128xbf16, #tpu.memory_space<vmem>>, vector<1x1x112x128xbf16>
    %21 = vector.shape_cast %20 : vector<1x1x112x128xbf16> to vector<112x128xbf16>
    %cst_24 = arith.constant dense<0.000000e+00> : vector<16x128xf32>
    %22 = tpu.matmul %0, %21, %cst_24 {dimension_numbers = #tpu.dot_dimension_numbers<[1], [0], [0], [1], [0, 0, 1, 1], [], []>} : vector<16x112xbf16>, vector<112x128xbf16>, vector<16x128xf32> -> vector<16x128xf32>
    %23 = arith.maximumf %19, %22 : vector<16x128xf32>
    %c0_25 = arith.constant 0 : index
    %c6 = arith.constant 6 : index
    %c0_26 = arith.constant 0 : index
    %c0_27 = arith.constant 0 : index
    %24 = vector.load %arg2[%c0_25, %c6, %c0_26, %c0_27] : memref<1x8x112x128xbf16, #tpu.memory_space<vmem>>, vector<1x1x112x128xbf16>
    %25 = vector.shape_cast %24 : vector<1x1x112x128xbf16> to vector<112x128xbf16>
    %cst_28 = arith.constant dense<0.000000e+00> : vector<16x128xf32>
    %26 = tpu.matmul %0, %25, %cst_28 {dimension_numbers = #tpu.dot_dimension_numbers<[1], [0], [0], [1], [0, 0, 1, 1], [], []>} : vector<16x112xbf16>, vector<112x128xbf16>, vector<16x128xf32> -> vector<16x128xf32>
    %27 = arith.maximumf %23, %26 : vector<16x128xf32>
    %c0_29 = arith.constant 0 : index
    %c7 = arith.constant 7 : index
    %c0_30 = arith.constant 0 : index
    %c0_31 = arith.constant 0 : index
    %28 = vector.load %arg2[%c0_29, %c7, %c0_30, %c0_31] : memref<1x8x112x128xbf16, #tpu.memory_space<vmem>>, vector<1x1x112x128xbf16>
    %29 = vector.shape_cast %28 : vector<1x1x112x128xbf16> to vector<112x128xbf16>
    %cst_32 = arith.constant dense<0.000000e+00> : vector<16x128xf32>
    %30 = tpu.matmul %0, %29, %cst_32 {dimension_numbers = #tpu.dot_dimension_numbers<[1], [0], [0], [1], [0, 0, 1, 1], [], []>} : vector<16x112xbf16>, vector<112x128xbf16>, vector<16x128xf32> -> vector<16x128xf32>
    %31 = arith.maximumf %27, %30 : vector<16x128xf32>
    %c0_33 = arith.constant 0 : index
    %c0_34 = arith.constant 0 : index
    %32 = vector.load %arg4[%c0_33, %c0_34] : memref<16x1xf32, #tpu.memory_space<vmem>>, vector<16x1xf32>
    %33 = vector.broadcast %32 : vector<16x1xf32> to vector<16x128xf32>
    %34 = arith.mulf %31, %33 : vector<16x128xf32>
    %c0_35 = arith.constant 0 : index
    %c0_36 = arith.constant 0 : index
    %35 = vector.load %arg5[%c0_35, %c0_36] : memref<16x1xf32, #tpu.memory_space<vmem>>, vector<16x1xf32>
    %36 = vector.broadcast %35 : vector<16x1xf32> to vector<16x128xf32>
    %37 = arith.addf %34, %36 : vector<16x128xf32>
    %cst_37 = arith.constant 0.000000e+00 : f32
    %38 = vector.broadcast %cst_37 : f32 to vector<16x128xf32>
    %39 = arith.cmpf ogt, %37, %38 : vector<16x128xf32>
    %cst_38 = arith.constant 0.00999999977 : f32
    %40 = vector.broadcast %cst_38 : f32 to vector<16x128xf32>
    %41 = arith.mulf %40, %37 : vector<16x128xf32>
    %42 = arith.select %39, %37, %41 : vector<16x128xi1>, vector<16x128xf32>
    %c0_39 = arith.constant 0 : index
    %c0_40 = arith.constant 0 : index
    %c0_41 = arith.constant 0 : index
    %43 = vector.load %arg6[%c0_39, %c0_40, %c0_41] : memref<1x16x128xf32, #tpu.memory_space<vmem>>, vector<1x16x128xf32>
    %44 = vector.shape_cast %43 : vector<1x16x128xf32> to vector<16x128xf32>
    %45 = vector.shape_cast %42 : vector<16x128xf32> to vector<1x16x128xf32>
    tpu.vector_store %arg6[%c0_39, %c0_40, %c0_41], %45 {strides = array<i32>} : memref<1x16x128xf32, #tpu.memory_space<vmem>>, vector<1x16x128xf32>,
    return
  }
  func.func @transform_0(%arg0: i32, %arg1: i32) -> (i32, i32, i32, i32) {
    %c0_i32 = arith.constant 0 : i32
    %c0_i32_0 = arith.constant 0 : i32
    %c0_i32_1 = arith.constant 0 : i32
    return %arg0, %c0_i32, %c0_i32_0, %arg1 : i32, i32, i32, i32
  }
  func.func @transform_1(%arg0: i32, %arg1: i32) -> (i32, i32) {
    %c0_i32 = arith.constant 0 : i32
    %c0_i32_0 = arith.constant 0 : i32
    %c0_i32_1 = arith.constant 0 : i32
    return %c0_i32, %c0_i32_0 : i32, i32
  }
  func.func @transform_2(%arg0: i32, %arg1: i32) -> (i32, i32) {
    %c0_i32 = arith.constant 0 : i32
    %c0_i32_0 = arith.constant 0 : i32
    %c0_i32_1 = arith.constant 0 : i32
    return %c0_i32, %c0_i32_0 : i32, i32
  }
  func.func @transform_3(%arg0: i32, %arg1: i32) -> (i32, i32) {
    %c0_i32 = arith.constant 0 : i32
    %c0_i32_0 = arith.constant 0 : i32
    %c0_i32_1 = arith.constant 0 : i32
    return %c0_i32, %c0_i32_0 : i32, i32
  }
  func.func @transform_4(%arg0: i32, %arg1: i32) -> (i32, i32, i32) {
    %c0_i32 = arith.constant 0 : i32
    %c0_i32_0 = arith.constant 0 : i32
    return %arg0, %c0_i32, %arg1 : i32, i32, i32
  }
}

</mosaic_0001>

<bundles_post_ra>
// kernel: convlayer_forward.1
= control target key start
LH: loop header
LB: loop body
LE: loop exit
PB: predicated region body
PF: predicated region fallthrough
CT: control target
= control target key end

     0   :  { %s2250_s15 = smov 0   ;;  %s2252_s16 = smov 0   ;;  %s2741_s0 = inlined_call_operand.vmem [shape: bf16[2,8,112,384], index: 0, kind: input, shape index: {}]   ;;  %s2742_s1 = inlined_call_operand.vmem [shape: bf16[16,112], index: 1, kind: input, shape index: {}]   ;;  %s2743_s2 = inlined_call_operand.vmem [shape: f32[16,1], index: 2, kind: input, shape index: {}]   ;;  %s2744_s3 = inlined_call_operand.vmem [shape: f32[16,1], index: 3, kind: input, shape index: {}]   ;;  %s2745_s4 = inlined_call_operand.vmem [shape: f32[2,16,384], index: 4, kind: output, shape index: {}]  }
   0x1   :  { %s2254_s17 = smov 0   ;;  %s2256_s18 = smov 0  }
   0x2   :  { %s2258_s19 = smov 0   ;;  %s2260_s20 = smov 0  }
   0x3   :  { %s2262_s21 = smov 0  }
   0x4 LB: > { %s23_s22 = sadd.s32 1, %s2212_s19  ;;  %s26_s23 = sadd.s32 1, %s2216_s20  ;;  %s2220_s21 = sphi %s2262_s21, %s14_s21   ;;  %s2216_s20 = sphi %s2260_s20, %s2752_s20   ;;  %s2212_s19 = sphi %s2258_s19, %s2751_s19   ;;  %s2208_s18 = sphi %s2256_s18, %s2750_s18   ;;  %s2204_s17 = sphi %s2254_s17, %s2749_s17   ;;  %s2200_s16 = sphi %s2252_s16, %s2748_s16   ;;  %s2196_s15 = sphi %s2250_s15, %s2747_s15  }
   0x5   : > { %p24_p0 = scmp.ge.s32.totalorder %s23_s22, 3  ;;  %s1662_s24 = sadd.s32 4294967295, %s2220_s21  }
   0x6   : > { %p42_p1 = scmp.ne.s32.totalorder %s2200_s16, %s2196_s15  ;;  %p43_p2 = scmp.eq.s32.totalorder %s2220_s21, 0 }
   0x7   : > { %s2754_s22 = smov (%p24_p0, %s23_s22), 0  ;;  %s2756_s23 = smov (!%p24_p0, %s26_s23), %s2216_s20 }
   0x8   : > { %p28_p3 = scmp.ge.s32.totalorder %s2756_s23, 2  ;;  %p137_p4 = scmp.eq.s32.totalorder %s1662_s24, 5 }
   0x9   : > { %s31_s25 = ssub.s32 %s2212_s19, %s2754_s22  ;;  %p44_p5 = por %p43_p2, %p42_p1 }
   0xa   : > { %s2758_s23 = smov (%p28_p3, %s2756_s23), 0  ;;  %p2298_p6 = por %p137_p4, %p42_p1 }
   0xb   : > { %s30_s27 = ssub.s32 %s2216_s20, %s2758_s23  ;;  %s35_s29 = sadd.s32 1, %s2200_s16 }
   0xc   : > { %s32_s28 = sor.u32 %s31_s25, %s30_s27  ;;  %p1665_p8 = scmp.ge.s32.totalorder %s2220_s21, 6 }
   0xd   : > { %p33_p7 = scmp.eq.s32.totalorder %s32_s28, 0 }
   0xe   : > { %168 = sbr.rel (%p1665_p8) target bundleno = 100 (0x64), region = 28 }
   0xf   : > { %s2306_s30 = scalar_select %p33_p7, %s2200_s16, %s35_s29  }
  0x13   : > { %171 = sbr.rel (!%p44_p5) target bundleno = 100 (0x64), region = 32  ;;  %s173_s5 = sand.u32 (%p44_p5), 1, %s2200_s16  }
  0x14   : > { %s2045_s6 = smul.u32 (%p44_p5), 336, %s2216_s20 }
  0x15   : > { %s2044_s7 = smul.u32 (%p44_p5), 448, %s173_s5 }
  0x16   : > { %s177_s8 = sadd.s32 (%p44_p5), %s2212_s19, %s2045_s6 }
  0x17   : > { %s1666_s9 = sshll.u32 (%p44_p5), %s177_s8, 2  ;;  %s2320_s13 = scalar_lea.vmem (%p44_p5), [#allocation2], %s2044_s7 }
  0x18   : > { %s2315_s12 = scalar_lea.vmem %s2741_s0, %s1666_s9 }
  0x19   : > { %v196_v0 = vld [vmem:[%s2315_s12] sm:$0xf]  ;;  %v198_v1 = vld [vmem:[%s2315_s12 + $0xc] sm:$0xf]  ;;  %v200_v2 = vld [vmem:[%s2315_s12 + $0x18] sm:$0xf] }
  0x1a   : > { %197 = vst [vmem:[%s2320_s13] sm:$0xf] %v196_v0  ;;  %199 = vst [vmem:[%s2320_s13 + $0x4] sm:$0xf] %v198_v1  ;;  %v202_v3 = vld [vmem:[%s2315_s12 + $0x24] sm:$0xf] }
  0x1b   : > { %201 = vst [vmem:[%s2320_s13 + $0x8] sm:$0xf] %v200_v2  ;;  %v204_v4 = vld [vmem:[%s2315_s12 + $0x30] sm:$0xf]  ;;  %v206_v5 = vld [vmem:[%s2315_s12 + $0x3c] sm:$0xf] }
  0x1c   : > { %203 = vst [vmem:[%s2320_s13 + $0xc] sm:$0xf] %v202_v3  ;;  %205 = vst [vmem:[%s2320_s13 + $0x10] sm:$0xf] %v204_v4  ;;  %v208_v6 = vld [vmem:[%s2315_s12 + $0x48] sm:$0xf] }
  0x1d   : > { %207 = vst [vmem:[%s2320_s13 + $0x14] sm:$0xf] %v206_v5  ;;  %v210_v7 = vld [vmem:[%s2315_s12 + $0x54] sm:$0xf]  ;;  %v212_v8 = vld [vmem:[%s2315_s12 + $0x60] sm:$0xf] }
  0x1e   : > { %209 = vst [vmem:[%s2320_s13 + $0x18] sm:$0xf] %v208_v6  ;;  %211 = vst [vmem:[%s2320_s13 + $0x1c] sm:$0xf] %v210_v7  ;;  %v214_v9 = vld [vmem:[%s2315_s12 + $0x6c] sm:$0xf] }
  0x1f   : > { %213 = vst [vmem:[%s2320_s13 + $0x20] sm:$0xf] %v212_v8  ;;  %v216_v10 = vld [vmem:[%s2315_s12 + $0x78] sm:$0xf]  ;;  %v218_v11 = vld [vmem:[%s2315_s12 + $0x84] sm:$0xf] }
  0x20   : > { %215 = vst [vmem:[%s2320_s13 + $0x24] sm:$0xf] %v214_v9  ;;  %217 = vst [vmem:[%s2320_s13 + $0x28] sm:$0xf] %v216_v10  ;;  %v220_v12 = vld [vmem:[%s2315_s12 + $0x90] sm:$0xf] }
  0x21   : > { %219 = vst [vmem:[%s2320_s13 + $0x2c] sm:$0xf] %v218_v11  ;;  %v222_v13 = vld [vmem:[%s2315_s12 + $0x9c] sm:$0xf]  ;;  %v224_v14 = vld [vmem:[%s2315_s12 + $0xa8] sm:$0xf] }
  0x22   : > { %221 = vst [vmem:[%s2320_s13 + $0x30] sm:$0xf] %v220_v12  ;;  %223 = vst [vmem:[%s2320_s13 + $0x34] sm:$0xf] %v222_v13  ;;  %v226_v15 = vld [vmem:[%s2315_s12 + $0xb4] sm:$0xf] }
  0x23   : > { %225 = vst [vmem:[%s2320_s13 + $0x38] sm:$0xf] %v224_v14  ;;  %v228_v16 = vld [vmem:[%s2315_s12 + $0xc0] sm:$0xf]  ;;  %v230_v17 = vld [vmem:[%s2315_s12 + $0xcc] sm:$0xf] }
  0x24   : > { %227 = vst [vmem:[%s2320_s13 + $0x3c] sm:$0xf] %v226_v15  ;;  %229 = vst [vmem:[%s2320_s13 + $0x40] sm:$0xf] %v228_v16  ;;  %v232_v18 = vld [vmem:[%s2315_s12 + $0xd8] sm:$0xf] }
  0x25   : > { %231 = vst [vmem:[%s2320_s13 + $0x44] sm:$0xf] %v230_v17  ;;  %v234_v19 = vld [vmem:[%s2315_s12 + $0xe4] sm:$0xf]  ;;  %v236_v20 = vld [vmem:[%s2315_s12 + $0xf0] sm:$0xf] }
  0x26   : > { %233 = vst [vmem:[%s2320_s13 + $0x48] sm:$0xf] %v232_v18  ;;  %235 = vst [vmem:[%s2320_s13 + $0x4c] sm:$0xf] %v234_v19  ;;  %v238_v21 = vld [vmem:[%s2315_s12 + $0xfc] sm:$0xf] }
  0x27   : > { %237 = vst [vmem:[%s2320_s13 + $0x50] sm:$0xf] %v236_v20  ;;  %v240_v22 = vld [vmem:[%s2315_s12 + $0x108] sm:$0xf]  ;;  %v242_v23 = vld [vmem:[%s2315_s12 + $0x114] sm:$0xf] }
  0x28   : > { %239 = vst [vmem:[%s2320_s13 + $0x54] sm:$0xf] %v238_v21  ;;  %241 = vst [vmem:[%s2320_s13 + $0x58] sm:$0xf] %v240_v22  ;;  %v244_v24 = vld [vmem:[%s2315_s12 + $0x120] sm:$0xf] }
  0x29   : > { %243 = vst [vmem:[%s2320_s13 + $0x5c] sm:$0xf] %v242_v23  ;;  %v246_v25 = vld [vmem:[%s2315_s12 + $0x12c] sm:$0xf]  ;;  %v248_v26 = vld [vmem:[%s2315_s12 + $0x138] sm:$0xf] }
  0x2a   : > { %245 = vst [vmem:[%s2320_s13 + $0x60] sm:$0xf] %v244_v24  ;;  %247 = vst [vmem:[%s2320_s13 + $0x64] sm:$0xf] %v246_v25  ;;  %v250_v27 = vld [vmem:[%s2315_s12 + $0x144] sm:$0xf] }
  0x2b   : > { %249 = vst [vmem:[%s2320_s13 + $0x68] sm:$0xf] %v248_v26  ;;  %v252_v28 = vld [vmem:[%s2315_s12 + $0x150] sm:$0xf]  ;;  %v254_v29 = vld [vmem:[%s2315_s12 + $0x15c] sm:$0xf] }
  0x2c   : > { %251 = vst [vmem:[%s2320_s13 + $0x6c] sm:$0xf] %v250_v27  ;;  %253 = vst [vmem:[%s2320_s13 + $0x70] sm:$0xf] %v252_v28  ;;  %v256_v30 = vld [vmem:[%s2315_s12 + $0x168] sm:$0xf] }
  0x2d   : > { %255 = vst [vmem:[%s2320_s13 + $0x74] sm:$0xf] %v254_v29  ;;  %v258_v31 = vld [vmem:[%s2315_s12 + $0x174] sm:$0xf]  ;;  %v260_v32 = vld [vmem:[%s2315_s12 + $0x180] sm:$0xf] }
  0x2e   : > { %257 = vst [vmem:[%s2320_s13 + $0x78] sm:$0xf] %v256_v30  ;;  %259 = vst [vmem:[%s2320_s13 + $0x7c] sm:$0xf] %v258_v31  ;;  %v262_v33 = vld [vmem:[%s2315_s12 + $0x18c] sm:$0xf] }
  0x2f   : > { %261 = vst [vmem:[%s2320_s13 + $0x80] sm:$0xf] %v260_v32  ;;  %v264_v34 = vld [vmem:[%s2315_s12 + $0x198] sm:$0xf]  ;;  %v266_v35 = vld [vmem:[%s2315_s12 + $0x1a4] sm:$0xf] }
  0x30   : > { %263 = vst [vmem:[%s2320_s13 + $0x84] sm:$0xf] %v262_v33  ;;  %265 = vst [vmem:[%s2320_s13 + $0x88] sm:$0xf] %v264_v34  ;;  %v268_v36 = vld [vmem:[%s2315_s12 + $0x1b0] sm:$0xf] }
  0x31   : > { %267 = vst [vmem:[%s2320_s13 + $0x8c] sm:$0xf] %v266_v35  ;;  %v270_v37 = vld [vmem:[%s2315_s12 + $0x1bc] sm:$0xf]  ;;  %v272_v38 = vld [vmem:[%s2315_s12 + $0x1c8] sm:$0xf] }
  0x32   : > { %269 = vst [vmem:[%s2320_s13 + $0x90] sm:$0xf] %v268_v36  ;;  %271 = vst [vmem:[%s2320_s13 + $0x94] sm:$0xf] %v270_v37  ;;  %v274_v39 = vld [vmem:[%s2315_s12 + $0x1d4] sm:$0xf] }
  0x33   : > { %273 = vst [vmem:[%s2320_s13 + $0x98] sm:$0xf] %v272_v38  ;;  %v276_v40 = vld [vmem:[%s2315_s12 + $0x1e0] sm:$0xf]  ;;  %v278_v41 = vld [vmem:[%s2315_s12 + $0x1ec] sm:$0xf] }
  0x34   : > { %275 = vst [vmem:[%s2320_s13 + $0x9c] sm:$0xf] %v274_v39  ;;  %277 = vst [vmem:[%s2320_s13 + $0xa0] sm:$0xf] %v276_v40  ;;  %v280_v42 = vld [vmem:[%s2315_s12 + $0x1f8] sm:$0xf] }
  0x35   : > { %279 = vst [vmem:[%s2320_s13 + $0xa4] sm:$0xf] %v278_v41  ;;  %v282_v43 = vld [vmem:[%s2315_s12 + $0x204] sm:$0xf]  ;;  %v284_v44 = vld [vmem:[%s2315_s12 + $0x210] sm:$0xf] }
  0x36   : > { %281 = vst [vmem:[%s2320_s13 + $0xa8] sm:$0xf] %v280_v42  ;;  %283 = vst [vmem:[%s2320_s13 + $0xac] sm:$0xf] %v282_v43  ;;  %v286_v45 = vld [vmem:[%s2315_s12 + $0x21c] sm:$0xf] }
  0x37   : > { %285 = vst [vmem:[%s2320_s13 + $0xb0] sm:$0xf] %v284_v44  ;;  %v288_v46 = vld [vmem:[%s2315_s12 + $0x228] sm:$0xf]  ;;  %v290_v47 = vld [vmem:[%s2315_s12 + $0x234] sm:$0xf] }
  0x38   : > { %287 = vst [vmem:[%s2320_s13 + $0xb4] sm:$0xf] %v286_v45  ;;  %289 = vst [vmem:[%s2320_s13 + $0xb8] sm:$0xf] %v288_v46  ;;  %v292_v48 = vld [vmem:[%s2315_s12 + $0x240] sm:$0xf] }
  0x39   : > { %291 = vst [vmem:[%s2320_s13 + $0xbc] sm:$0xf] %v290_v47  ;;  %v294_v49 = vld [vmem:[%s2315_s12 + $0x24c] sm:$0xf]  ;;  %v296_v50 = vld [vmem:[%s2315_s12 + $0x258] sm:$0xf] }
  0x3a   : > { %293 = vst [vmem:[%s2320_s13 + $0xc0] sm:$0xf] %v292_v48  ;;  %295 = vst [vmem:[%s2320_s13 + $0xc4] sm:$0xf] %v294_v49  ;;  %v298_v51 = vld [vmem:[%s2315_s12 + $0x264] sm:$0xf] }
  0x3b   : > { %297 = vst [vmem:[%s2320_s13 + $0xc8] sm:$0xf] %v296_v50  ;;  %v300_v52 = vld [vmem:[%s2315_s12 + $0x270] sm:$0xf]  ;;  %v302_v53 = vld [vmem:[%s2315_s12 + $0x27c] sm:$0xf] }
  0x3c   : > { %299 = vst [vmem:[%s2320_s13 + $0xcc] sm:$0xf] %v298_v51  ;;  %301 = vst [vmem:[%s2320_s13 + $0xd0] sm:$0xf] %v300_v52  ;;  %v304_v54 = vld [vmem:[%s2315_s12 + $0x288] sm:$0xf] }
  0x3d   : > { %303 = vst [vmem:[%s2320_s13 + $0xd4] sm:$0xf] %v302_v53  ;;  %v306_v55 = vld [vmem:[%s2315_s12 + $0x294] sm:$0xf]  ;;  %v308_v56 = vld [vmem:[%s2315_s12 + $0x2a0] sm:$0xf] }
  0x3e   : > { %305 = vst [vmem:[%s2320_s13 + $0xd8] sm:$0xf] %v304_v54  ;;  %307 = vst [vmem:[%s2320_s13 + $0xdc] sm:$0xf] %v306_v55  ;;  %v310_v57 = vld [vmem:[%s2315_s12 + $0x2ac] sm:$0xf] }
  0x3f   : > { %309 = vst [vmem:[%s2320_s13 + $0xe0] sm:$0xf] %v308_v56  ;;  %v312_v58 = vld [vmem:[%s2315_s12 + $0x2b8] sm:$0xf]  ;;  %v314_v59 = vld [vmem:[%s2315_s12 + $0x2c4] sm:$0xf] }
  0x40   : > { %311 = vst [vmem:[%s2320_s13 + $0xe4] sm:$0xf] %v310_v57  ;;  %313 = vst [vmem:[%s2320_s13 + $0xe8] sm:$0xf] %v312_v58  ;;  %v316_v60 = vld [vmem:[%s2315_s12 + $0x2d0] sm:$0xf] }
  0x41   : > { %315 = vst [vmem:[%s2320_s13 + $0xec] sm:$0xf] %v314_v59  ;;  %v318_v61 = vld [vmem:[%s2315_s12 + $0x2dc] sm:$0xf]  ;;  %v320_v62 = vld [vmem:[%s2315_s12 + $0x2e8] sm:$0xf] }
  0x42   : > { %317 = vst [vmem:[%s2320_s13 + $0xf0] sm:$0xf] %v316_v60  ;;  %319 = vst [vmem:[%s2320_s13 + $0xf4] sm:$0xf] %v318_v61  ;;  %v322_v63 = vld [vmem:[%s2315_s12 + $0x2f4] sm:$0xf] }
  0x43   : > { %321 = vst [vmem:[%s2320_s13 + $0xf8] sm:$0xf] %v320_v62  ;;  %v324_v0 = vld [vmem:[%s2315_s12 + $0x300] sm:$0xf]  ;;  %v326_v1 = vld [vmem:[%s2315_s12 + $0x30c] sm:$0xf] }
  0x44   : > { %323 = vst [vmem:[%s2320_s13 + $0xfc] sm:$0xf] %v322_v63  ;;  %325 = vst [vmem:[%s2320_s13 + $0x100] sm:$0xf] %v324_v0  ;;  %v328_v2 = vld [vmem:[%s2315_s12 + $0x318] sm:$0xf] }
  0x45   : > { %327 = vst [vmem:[%s2320_s13 + $0x104] sm:$0xf] %v326_v1  ;;  %v330_v3 = vld [vmem:[%s2315_s12 + $0x324] sm:$0xf]  ;;  %v332_v4 = vld [vmem:[%s2315_s12 + $0x330] sm:$0xf] }
  0x46   : > { %329 = vst [vmem:[%s2320_s13 + $0x108] sm:$0xf] %v328_v2  ;;  %331 = vst [vmem:[%s2320_s13 + $0x10c] sm:$0xf] %v330_v3  ;;  %v334_v5 = vld [vmem:[%s2315_s12 + $0x33c] sm:$0xf] }
  0x47   : > { %333 = vst [vmem:[%s2320_s13 + $0x110] sm:$0xf] %v332_v4  ;;  %v336_v6 = vld [vmem:[%s2315_s12 + $0x348] sm:$0xf]  ;;  %v338_v7 = vld [vmem:[%s2315_s12 + $0x354] sm:$0xf] }
  0x48   : > { %335 = vst [vmem:[%s2320_s13 + $0x114] sm:$0xf] %v334_v5  ;;  %337 = vst [vmem:[%s2320_s13 + $0x118] sm:$0xf] %v336_v6  ;;  %v340_v8 = vld [vmem:[%s2315_s12 + $0x360] sm:$0xf] }
  0x49   : > { %339 = vst [vmem:[%s2320_s13 + $0x11c] sm:$0xf] %v338_v7  ;;  %v342_v9 = vld [vmem:[%s2315_s12 + $0x36c] sm:$0xf]  ;;  %v344_v10 = vld [vmem:[%s2315_s12 + $0x378] sm:$0xf] }
  0x4a   : > { %341 = vst [vmem:[%s2320_s13 + $0x120] sm:$0xf] %v340_v8  ;;  %343 = vst [vmem:[%s2320_s13 + $0x124] sm:$0xf] %v342_v9  ;;  %v346_v11 = vld [vmem:[%s2315_s12 + $0x384] sm:$0xf] }
  0x4b   : > { %345 = vst [vmem:[%s2320_s13 + $0x128] sm:$0xf] %v344_v10  ;;  %v348_v12 = vld [vmem:[%s2315_s12 + $0x390] sm:$0xf]  ;;  %v350_v13 = vld [vmem:[%s2315_s12 + $0x39c] sm:$0xf] }
  0x4c   : > { %347 = vst [vmem:[%s2320_s13 + $0x12c] sm:$0xf] %v346_v11  ;;  %349 = vst [vmem:[%s2320_s13 + $0x130] sm:$0xf] %v348_v12  ;;  %v352_v14 = vld [vmem:[%s2315_s12 + $0x3a8] sm:$0xf] }
  0x4d   : > { %351 = vst [vmem:[%s2320_s13 + $0x134] sm:$0xf] %v350_v13  ;;  %v354_v15 = vld [vmem:[%s2315_s12 + $0x3b4] sm:$0xf]  ;;  %v356_v16 = vld [vmem:[%s2315_s12 + $0x3c0] sm:$0xf] }
  0x4e   : > { %353 = vst [vmem:[%s2320_s13 + $0x138] sm:$0xf] %v352_v14  ;;  %355 = vst [vmem:[%s2320_s13 + $0x13c] sm:$0xf] %v354_v15  ;;  %v358_v17 = vld [vmem:[%s2315_s12 + $0x3cc] sm:$0xf] }
  0x4f   : > { %357 = vst [vmem:[%s2320_s13 + $0x140] sm:$0xf] %v356_v16  ;;  %v360_v18 = vld [vmem:[%s2315_s12 + $0x3d8] sm:$0xf]  ;;  %v362_v19 = vld [vmem:[%s2315_s12 + $0x3e4] sm:$0xf] }
  0x50   : > { %359 = vst [vmem:[%s2320_s13 + $0x144] sm:$0xf] %v358_v17  ;;  %361 = vst [vmem:[%s2320_s13 + $0x148] sm:$0xf] %v360_v18  ;;  %v364_v20 = vld [vmem:[%s2315_s12 + $0x3f0] sm:$0xf] }
  0x51   : > { %363 = vst [vmem:[%s2320_s13 + $0x14c] sm:$0xf] %v362_v19  ;;  %v366_v21 = vld [vmem:[%s2315_s12 + $0x3fc] sm:$0xf]  ;;  %v368_v22 = vld [vmem:[%s2315_s12 + $0x408] sm:$0xf] }
  0x52   : > { %365 = vst [vmem:[%s2320_s13 + $0x150] sm:$0xf] %v364_v20  ;;  %367 = vst [vmem:[%s2320_s13 + $0x154] sm:$0xf] %v366_v21  ;;  %v370_v23 = vld [vmem:[%s2315_s12 + $0x414] sm:$0xf] }
  0x53   : > { %369 = vst [vmem:[%s2320_s13 + $0x158] sm:$0xf] %v368_v22  ;;  %v372_v24 = vld [vmem:[%s2315_s12 + $0x420] sm:$0xf]  ;;  %v374_v25 = vld [vmem:[%s2315_s12 + $0x42c] sm:$0xf] }
  0x54   : > { %371 = vst [vmem:[%s2320_s13 + $0x15c] sm:$0xf] %v370_v23  ;;  %373 = vst [vmem:[%s2320_s13 + $0x160] sm:$0xf] %v372_v24  ;;  %v376_v26 = vld [vmem:[%s2315_s12 + $0x438] sm:$0xf] }
  0x55   : > { %375 = vst [vmem:[%s2320_s13 + $0x164] sm:$0xf] %v374_v25  ;;  %v378_v27 = vld [vmem:[%s2315_s12 + $0x444] sm:$0xf]  ;;  %v380_v28 = vld [vmem:[%s2315_s12 + $0x450] sm:$0xf] }
  0x56   : > { %377 = vst [vmem:[%s2320_s13 + $0x168] sm:$0xf] %v376_v26  ;;  %379 = vst [vmem:[%s2320_s13 + $0x16c] sm:$0xf] %v378_v27  ;;  %v382_v29 = vld [vmem:[%s2315_s12 + $0x45c] sm:$0xf] }
  0x57   : > { %381 = vst [vmem:[%s2320_s13 + $0x170] sm:$0xf] %v380_v28  ;;  %v384_v30 = vld [vmem:[%s2315_s12 + $0x468] sm:$0xf]  ;;  %v386_v31 = vld [vmem:[%s2315_s12 + $0x474] sm:$0xf] }
  0x58   : > { %383 = vst [vmem:[%s2320_s13 + $0x174] sm:$0xf] %v382_v29  ;;  %385 = vst [vmem:[%s2320_s13 + $0x178] sm:$0xf] %v384_v30  ;;  %v388_v32 = vld [vmem:[%s2315_s12 + $0x480] sm:$0xf] }
  0x59   : > { %387 = vst [vmem:[%s2320_s13 + $0x17c] sm:$0xf] %v386_v31  ;;  %v390_v33 = vld [vmem:[%s2315_s12 + $0x48c] sm:$0xf]  ;;  %v392_v34 = vld [vmem:[%s2315_s12 + $0x498] sm:$0xf] }
  0x5a   : > { %389 = vst [vmem:[%s2320_s13 + $0x180] sm:$0xf] %v388_v32  ;;  %391 = vst [vmem:[%s2320_s13 + $0x184] sm:$0xf] %v390_v33  ;;  %v394_v35 = vld [vmem:[%s2315_s12 + $0x4a4] sm:$0xf] }
  0x5b   : > { %393 = vst [vmem:[%s2320_s13 + $0x188] sm:$0xf] %v392_v34  ;;  %v396_v36 = vld [vmem:[%s2315_s12 + $0x4b0] sm:$0xf]  ;;  %v398_v37 = vld [vmem:[%s2315_s12 + $0x4bc] sm:$0xf] }
  0x5c   : > { %395 = vst [vmem:[%s2320_s13 + $0x18c] sm:$0xf] %v394_v35  ;;  %397 = vst [vmem:[%s2320_s13 + $0x190] sm:$0xf] %v396_v36  ;;  %v400_v38 = vld [vmem:[%s2315_s12 + $0x4c8] sm:$0xf] }
  0x5d   : > { %399 = vst [vmem:[%s2320_s13 + $0x194] sm:$0xf] %v398_v37  ;;  %v402_v39 = vld [vmem:[%s2315_s12 + $0x4d4] sm:$0xf]  ;;  %v404_v40 = vld [vmem:[%s2315_s12 + $0x4e0] sm:$0xf] }
  0x5e   : > { %401 = vst [vmem:[%s2320_s13 + $0x198] sm:$0xf] %v400_v38  ;;  %403 = vst [vmem:[%s2320_s13 + $0x19c] sm:$0xf] %v402_v39  ;;  %v406_v41 = vld [vmem:[%s2315_s12 + $0x4ec] sm:$0xf] }
  0x5f   : > { %405 = vst [vmem:[%s2320_s13 + $0x1a0] sm:$0xf] %v404_v40  ;;  %v408_v42 = vld [vmem:[%s2315_s12 + $0x4f8] sm:$0xf]  ;;  %v410_v43 = vld [vmem:[%s2315_s12 + $0x504] sm:$0xf] }
  0x60   : > { %407 = vst [vmem:[%s2320_s13 + $0x1a4] sm:$0xf] %v406_v41  ;;  %409 = vst [vmem:[%s2320_s13 + $0x1a8] sm:$0xf] %v408_v42  ;;  %v412_v44 = vld [vmem:[%s2315_s12 + $0x510] sm:$0xf] }
  0x61   : > { %411 = vst [vmem:[%s2320_s13 + $0x1ac] sm:$0xf] %v410_v43  ;;  %v414_v45 = vld [vmem:[%s2315_s12 + $0x51c] sm:$0xf]  ;;  %v416_v46 = vld [vmem:[%s2315_s12 + $0x528] sm:$0xf] }
  0x62   : > { %413 = vst [vmem:[%s2320_s13 + $0x1b0] sm:$0xf] %v412_v44  ;;  %415 = vst [vmem:[%s2320_s13 + $0x1b4] sm:$0xf] %v414_v45  ;;  %v418_v47 = vld [vmem:[%s2315_s12 + $0x534] sm:$0xf] }
  0x63   : > { %417 = vst [vmem:[%s2320_s13 + $0x1b8] sm:$0xf] %v416_v46  ;;  %419 = vst [vmem:[%s2320_s13 + $0x1bc] sm:$0xf] %v418_v47 }
  0x64 PF: > { %p1667_p9 = scmp.ge.s32.totalorder %s2220_s21, 1  ;;  %p666_p10 = scmp.lt.s32.totalorder %s2220_s21, 7 }
  0x66   : > { %p667_p11 = pnand %p1667_p9, %p666_p10 }
  0x67   : > { %s673_s14 = sand.u32 (!%p667_p11), 1, %s2196_s15  }
  0x68   : > { %670 = sbr.rel (%p667_p11) target bundleno = 442 (0x1ba), region = 73  ;;  %s1668_s12 = sshll.u32 (!%p667_p11), %s673_s14, 4 }
  0x69   : > { %s2046_s24 = smul.u32 (!%p667_p11), 448, %s673_s14  ;;  %s696_s13 = scalar_lea.vmem (!%p667_p11), [#allocation3], %s1668_s12 }
  0x6b   : > { %s2563_s7 = scalar_lea.vmem (!%p667_p11), [#allocation2], %s2046_s24 }
  0x6d   : > { %v2222_v48 = vmov 0.0   ;;  %v1506_v49 = vld [vmem:[%s2743_s2] sm:$0xff]  ;;  %vm2223_vm0 = vmmov 0   ;;  %v2224_v51 = vmov 0   ;;  %v1507_v52 = vld [vmem:[%s2743_s2 + $0x8] sm:$0xff]  ;;  %v2109_v53 = vld [vmem:[%s2563_s7 + $0x30] sm:$0xff]  }
  0x6e   : > { %1900 = vmatprep.subr.bf16.mxu0 %v2222_v48  ;;  %1918 = vmatprep.subr.bf16.mxu1 %v2222_v48  ;;  %v1520_v50 = vld [vmem:[%s2744_s3] sm:$0xff]  ;;  %v1521_v54 = vld [vmem:[%s2744_s3 + $0x8] sm:$0xff]  ;;  %v2114_v59 = vld [vmem:[%s2563_s7 + $0x58] sm:$0xff]   ;;  %vm761_vm1 = vcmask 916480   ;;  %s2047_s15 = smul.u32 (%p2298_p6), 6, %s2208_s18 }
  0x6f   : > { %1914 = vmatprep.mubr.msk.bf16.mxu0 %vm2223_vm0, %v2222_v48  ;;  %1932 = vmatprep.mubr.msk.bf16.mxu1 %vm2223_vm0, %v2222_v48  ;;  %v2110_v55 = vld [vmem:[%s2563_s7 + $0x68] sm:$0xff]   ;;  %v2112_v57 = vld [vmem:[%s2563_s7 + $0x60] sm:$0xff]   ;;  %v2115_v60 = vld [vmem:[%s2563_s7 + $0x18] sm:$0xff]  }
  0x70   : > { %2107 = vset.pattern.permute.xlu0 %v2224_v51  ;;  %2108 = vset.pattern.permute.xlu1 %v2224_v51  ;;  %v2111_v56 = vld [vmem:[%s2563_s7 + $0x28] sm:$0xff]   ;;  %v2113_v58 = vld [vmem:[%s2563_s7 + $0x20] sm:$0xff]   ;;  %v2116_v61 = vld [vmem:[%s2563_s7 + $0x50] sm:$0xff]   ;;  %s1550_s14 = sadd.s32 (%p2298_p6), %s2204_s17, %s2047_s15 }
  0x71   : > { %1510 = vperm.xlu0 %2107, %v1506_v49   ;;  %1524 = vperm.xlu1 %2108, %v1520_v50   ;;  %v2117_v62 = vld [vmem:[%s2563_s7 + $0x10] sm:$0xff]   ;;  %v2118_v63 = vld [vmem:[%s2563_s7 + $0x48] sm:$0xff]   ;;  %v2120_v1 = vld [vmem:[%s2563_s7 + $0x40] sm:$0xff]   ;;  %s1833_s24 = sshll.u32 (%p2298_p6), %s1550_s14, 3 }
  0x72   : > { %1901 = vmatpush3.bf16.msra.mxu0 %v2109_v53  ;;  %1919 = vmatpush3.bf16.msra.mxu1 %v2110_v55  ;;  %v2119_v0 = vld [vmem:[%s2563_s7 + $0x8] sm:$0xff]   ;;  %v2121_v2 = vld [vmem:[%s2563_s7] sm:$0xff]   ;;  %v2122_v3 = vld [vmem:[%s2563_s7 + $0x38] sm:$0xff]   ;;  %s1552_s28 = scalar_lea.vmem (%p2298_p6), %s2745_s4, %s1833_s24 }
  0x73   : > { %1902 = vmatprep.subr.bf16.mxu0 %v2222_v48  ;;  %1920 = vmatprep.subr.bf16.mxu1 %v2222_v48  ;;  %v2597_v4 = vld [vmem:[%s2742_s1] sm:$0xff]   ;;  %v2125_v6 = vld [vmem:[%s2563_s7 + $0xd8] sm:$0xff]   ;;  %v2127_v8 = vld [vmem:[%s2563_s7 + $0xd0] sm:$0xff]  }
  0x74   : > { %v2124_v5 = vld [vmem:[%s2563_s7 + $0xa0] sm:$0xff]   ;;  %v2126_v7 = vld [vmem:[%s2563_s7 + $0x98] sm:$0xff]   ;;  %v2128_v9 = vld [vmem:[%s2563_s7 + $0x90] sm:$0xff]  }
  0x75   : > { %1515 = vperm.xlu0 %2107, %v1507_v52   ;;  %1529 = vperm.xlu1 %2108, %v1521_v54   ;;  %v2129_v10 = vld [vmem:[%s2563_s7 + $0xc8] sm:$0xff]   ;;  %v2131_v12 = vld [vmem:[%s2563_s7 + $0xc0] sm:$0xff]   ;;  %v2133_v14 = vld [vmem:[%s2563_s7 + $0xb8] sm:$0xff]  }
  0x76   : > { %1903 = vmatpush3.bf16.msra.mxu0 %v2111_v56  ;;  %1921 = vmatpush3.bf16.msra.mxu1 %v2112_v57  ;;  %v2130_v11 = vld [vmem:[%s2563_s7 + $0x88] sm:$0xff]   ;;  %v2132_v13 = vld [vmem:[%s2563_s7 + $0x80] sm:$0xff]   ;;  %v2134_v15 = vld [vmem:[%s2563_s7 + $0x78] sm:$0xff]  }
  0x77   : > { %1904 = vmatprep.subr.bf16.mxu0 %v2222_v48  ;;  %1922 = vmatprep.subr.bf16.mxu1 %v2222_v48  ;;  %v2135_v16 = vld [vmem:[%s2563_s7 + $0xb0] sm:$0xff]   ;;  %v2137_v18 = vld [vmem:[%s2563_s7 + $0xa8] sm:$0xff]   ;;  %v2141_v22 = vld [vmem:[%s2563_s7 + $0x140] sm:$0xff]  }
  0x78   : > { %v2136_v17 = vld [vmem:[%s2563_s7 + $0x70] sm:$0xff]   ;;  %v2139_v20 = vld [vmem:[%s2563_s7 + $0x148] sm:$0xff]   ;;  %v2142_v23 = vld [vmem:[%s2563_s7 + $0x100] sm:$0xff]  }
  0x79   : > { %v2138_v19 = vld [vmem:[%s2563_s7 + $0x110] sm:$0xff]   ;;  %v2140_v21 = vld [vmem:[%s2563_s7 + $0x108] sm:$0xff]   ;;  %v2143_v24 = vld [vmem:[%s2563_s7 + $0x138] sm:$0xff]  }
  0x7a   : > { %1905 = vmatpush3.bf16.msra.mxu0 %v2113_v58  ;;  %1923 = vmatpush3.bf16.msra.mxu1 %v2114_v59  ;;  %v2144_v25 = vld [vmem:[%s2563_s7 + $0xf8] sm:$0xff]   ;;  %v2145_v26 = vld [vmem:[%s2563_s7 + $0x130] sm:$0xff]   ;;  %v2147_v28 = vld [vmem:[%s2563_s7 + $0x128] sm:$0xff]  }
  0x7b   : > { %1906 = vmatprep.subr.bf16.mxu0 %v2222_v48  ;;  %1924 = vmatprep.subr.bf16.mxu1 %v2222_v48  ;;  %v2146_v27 = vld [vmem:[%s2563_s7 + $0xf0] sm:$0xff]   ;;  %v2148_v29 = vld [vmem:[%s2563_s7 + $0xe8] sm:$0xff]   ;;  %v2149_v30 = vld [vmem:[%s2563_s7 + $0x120] sm:$0xff]  }
  0x7c   : > { %v2150_v31 = vld [vmem:[%s2563_s7 + $0xe0] sm:$0xff]   ;;  %v2151_v32 = vld [vmem:[%s2563_s7 + $0x118] sm:$0xff]   ;;  %v2155_v36 = vld [vmem:[%s2563_s7 + $0x1b0] sm:$0xff]  }
  0x7d   : > { %v2152_v33 = vld [vmem:[%s2563_s7 + $0x180] sm:$0xff]   ;;  %v2153_v34 = vld [vmem:[%s2563_s7 + $0x1b8] sm:$0xff]   ;;  %v2156_v37 = vld [vmem:[%s2563_s7 + $0x170] sm:$0xff]  }
  0x7e   : > { %1907 = vmatpush3.bf16.msra.mxu0 %v2115_v60  ;;  %1925 = vmatpush3.bf16.msra.mxu1 %v2116_v61  ;;  %v2154_v35 = vld [vmem:[%s2563_s7 + $0x178] sm:$0xff]   ;;  %v2157_v38 = vld [vmem:[%s2563_s7 + $0x1a8] sm:$0xff]   ;;  %v2159_v40 = vld [vmem:[%s2563_s7 + $0x1a0] sm:$0xff]  }
  0x7f   : > { %1908 = vmatprep.subr.bf16.mxu0 %v2222_v48  ;;  %1926 = vmatprep.subr.bf16.mxu1 %v2222_v48  ;;  %v2158_v39 = vld [vmem:[%s2563_s7 + $0x168] sm:$0xff]   ;;  %v2160_v41 = vld [vmem:[%s2563_s7 + $0x160] sm:$0xff]   ;;  %v2161_v42 = vld [vmem:[%s2563_s7 + $0x198] sm:$0xff]  }
  0x80   : > { %v2162_v43 = vld [vmem:[%s2563_s7 + $0x158] sm:$0xff]   ;;  %v2163_v44 = vld [vmem:[%s2563_s7 + $0x190] sm:$0xff]   ;;  %v2165_v46 = vld [vmem:[%s2563_s7 + $0x188] sm:$0xff]  }
  0x81   : > { %v2164_v45 = vld [vmem:[%s2563_s7 + $0x150] sm:$0xff]  }
  0x82   : > { %1909 = vmatpush3.bf16.msra.mxu0 %v2117_v62  ;;  %1927 = vmatpush3.bf16.msra.mxu1 %v2118_v63 }
  0x83   : > { %1910 = vmatprep.subr.bf16.mxu0 %v2222_v48  ;;  %1928 = vmatprep.subr.bf16.mxu1 %v2222_v48 }
  0x86   : > { %1911 = vmatpush3.bf16.msra.mxu0 %v2119_v0  ;;  %1929 = vmatpush3.bf16.msra.mxu1 %v2120_v1 }
  0x87   : > { %1912 = vmatprep.subr.bf16.mxu0 %v2222_v48  ;;  %1930 = vmatprep.subr.bf16.mxu1 %v2222_v48 }
  0x8a   : > { %1913 = vmatpush3.bf16.msra.mxu0 %v2121_v2  ;;  %1931 = vmatpush3.bf16.msra.mxu1 %v2122_v3 }
  0x8b   : > { %1936 = vmatprep.subr.bf16.mxu0 %v2222_v48  ;;  %1954 = vmatprep.subr.bf16.mxu1 %v2222_v48 }
  0x8d   : > { %1915 = vmatmul.mubr.msk.bf16.vlgmr.msra.gmra.mxu0 %vm761_vm1, %v2597_v4  ;;  %1933 = vmatmul.mubr.msk.bf16.vlgmr.msra.gmra.mxu1 %vm761_vm1, %v2597_v4 }
  0x8e   : > { %1937 = vmatpush3.bf16.msra.mxu0 %v2124_v5  ;;  %1955 = vmatpush3.bf16.msra.mxu1 %v2125_v6 }
  0x8f   : > { %1938 = vmatprep.subr.bf16.mxu0 %v2222_v48  ;;  %1956 = vmatprep.subr.bf16.mxu1 %v2222_v48 }
  0x90   : > { %1950 = vmatprep.mubr.msk.bf16.mxu0 %vm2223_vm0, %v2222_v48  ;;  %1968 = vmatprep.mubr.msk.bf16.mxu1 %vm2223_vm0, %v2222_v48 }
  0x92   : > { %1939 = vmatpush3.bf16.msra.mxu0 %v2126_v7  ;;  %1957 = vmatpush3.bf16.msra.mxu1 %v2127_v8 }
  0x93   : > { %1940 = vmatprep.subr.bf16.mxu0 %v2222_v48  ;;  %1958 = vmatprep.subr.bf16.mxu1 %v2222_v48 }
  0x96   : > { %1941 = vmatpush3.bf16.msra.mxu0 %v2128_v9  ;;  %1959 = vmatpush3.bf16.msra.mxu1 %v2129_v10 }
  0x97   : > { %1942 = vmatprep.subr.bf16.mxu0 %v2222_v48  ;;  %1960 = vmatprep.subr.bf16.mxu1 %v2222_v48 }
  0x9a   : > { %1943 = vmatpush3.bf16.msra.mxu0 %v2130_v11  ;;  %1961 = vmatpush3.bf16.msra.mxu1 %v2131_v12 }
  0x9b   : > { %1944 = vmatprep.subr.bf16.mxu0 %v2222_v48  ;;  %1962 = vmatprep.subr.bf16.mxu1 %v2222_v48 }
  0x9e   : > { %1945 = vmatpush3.bf16.msra.mxu0 %v2132_v13  ;;  %1963 = vmatpush3.bf16.msra.mxu1 %v2133_v14 }
  0x9f   : > { %1946 = vmatprep.subr.bf16.mxu0 %v2222_v48  ;;  %1964 = vmatprep.subr.bf16.mxu1 %v2222_v48 }
  0xa2   : > { %1947 = vmatpush3.bf16.msra.mxu0 %v2134_v15  ;;  %1965 = vmatpush3.bf16.msra.mxu1 %v2135_v16 }
  0xa3   : > { %1948 = vmatprep.subr.bf16.mxu0 %v2222_v48  ;;  %1966 = vmatprep.subr.bf16.mxu1 %v2222_v48 }
  0xa6   : > { %1949 = vmatpush3.bf16.msra.mxu0 %v2136_v17  ;;  %1967 = vmatpush3.bf16.msra.mxu1 %v2137_v18 }
  0xa7   : > { %1972 = vmatprep.subr.bf16.mxu0 %v2222_v48  ;;  %1990 = vmatprep.subr.bf16.mxu1 %v2222_v48 }
  0xa9   : > { %1951 = vmatmul.mubr.msk.bf16.vlgmr.msra.gmra.mxu0 %vm761_vm1, %v2597_v4  ;;  %1969 = vmatmul.mubr.msk.bf16.vlgmr.msra.gmra.mxu1 %vm761_vm1, %v2597_v4 }
  0xaa   : > { %1973 = vmatpush3.bf16.msra.mxu0 %v2138_v19  ;;  %1991 = vmatpush3.bf16.msra.mxu1 %v2139_v20 }
  0xab   : > { %1974 = vmatprep.subr.bf16.mxu0 %v2222_v48  ;;  %1992 = vmatprep.subr.bf16.mxu1 %v2222_v48 }
  0xac   : > { %1986 = vmatprep.mubr.msk.bf16.mxu0 %vm2223_vm0, %v2222_v48  ;;  %2004 = vmatprep.mubr.msk.bf16.mxu1 %vm2223_vm0, %v2222_v48 }
  0xae   : > { %1975 = vmatpush3.bf16.msra.mxu0 %v2140_v21  ;;  %1993 = vmatpush3.bf16.msra.mxu1 %v2141_v22 }
  0xaf   : > { %1976 = vmatprep.subr.bf16.mxu0 %v2222_v48  ;;  %1994 = vmatprep.subr.bf16.mxu1 %v2222_v48 }
  0xb2   : > { %1977 = vmatpush3.bf16.msra.mxu0 %v2142_v23  ;;  %1995 = vmatpush3.bf16.msra.mxu1 %v2143_v24 }
  0xb3   : > { %1978 = vmatprep.subr.bf16.mxu0 %v2222_v48  ;;  %1996 = vmatprep.subr.bf16.mxu1 %v2222_v48 }
  0xb6   : > { %1979 = vmatpush3.bf16.msra.mxu0 %v2144_v25  ;;  %1997 = vmatpush3.bf16.msra.mxu1 %v2145_v26 }
  0xb7   : > { %1980 = vmatprep.subr.bf16.mxu0 %v2222_v48  ;;  %1998 = vmatprep.subr.bf16.mxu1 %v2222_v48 }
  0xba   : > { %1981 = vmatpush3.bf16.msra.mxu0 %v2146_v27  ;;  %1999 = vmatpush3.bf16.msra.mxu1 %v2147_v28 }
  0xbb   : > { %1982 = vmatprep.subr.bf16.mxu0 %v2222_v48  ;;  %2000 = vmatprep.subr.bf16.mxu1 %v2222_v48 }
  0xbe   : > { %1983 = vmatpush3.bf16.msra.mxu0 %v2148_v29  ;;  %2001 = vmatpush3.bf16.msra.mxu1 %v2149_v30 }
  0xbf   : > { %1984 = vmatprep.subr.bf16.mxu0 %v2222_v48  ;;  %2002 = vmatprep.subr.bf16.mxu1 %v2222_v48 }
  0xc2   : > { %1985 = vmatpush3.bf16.msra.mxu0 %v2150_v31  ;;  %2003 = vmatpush3.bf16.msra.mxu1 %v2151_v32 }
  0xc3   : > { %2008 = vmatprep.subr.bf16.mxu0 %v2222_v48  ;;  %2026 = vmatprep.subr.bf16.mxu1 %v2222_v48 }
  0xc5   : > { %1987 = vmatmul.mubr.msk.bf16.vlgmr.msra.gmra.mxu0 %vm761_vm1, %v2597_v4  ;;  %2005 = vmatmul.mubr.msk.bf16.vlgmr.msra.gmra.mxu1 %vm761_vm1, %v2597_v4 }
  0xc6   : > { %2009 = vmatpush3.bf16.msra.mxu0 %v2152_v33  ;;  %2027 = vmatpush3.bf16.msra.mxu1 %v2153_v34 }
  0xc7   : > { %2010 = vmatprep.subr.bf16.mxu0 %v2222_v48  ;;  %2028 = vmatprep.subr.bf16.mxu1 %v2222_v48 }
  0xc8   : > { %2022 = vmatprep.mubr.msk.bf16.mxu0 %vm2223_vm0, %v2222_v48  ;;  %2040 = vmatprep.mubr.msk.bf16.mxu1 %vm2223_vm0, %v2222_v48 }
  0xca   : > { %2011 = vmatpush3.bf16.msra.mxu0 %v2154_v35  ;;  %2029 = vmatpush3.bf16.msra.mxu1 %v2155_v36 }
  0xcb   : > { %2012 = vmatprep.subr.bf16.mxu0 %v2222_v48  ;;  %2030 = vmatprep.subr.bf16.mxu1 %v2222_v48 }
  0xce   : > { %2013 = vmatpush3.bf16.msra.mxu0 %v2156_v37  ;;  %2031 = vmatpush3.bf16.msra.mxu1 %v2157_v38 }
  0xcf   : > { %2014 = vmatprep.subr.bf16.mxu0 %v2222_v48  ;;  %2032 = vmatprep.subr.bf16.mxu1 %v2222_v48 }
  0xd2   : > { %2015 = vmatpush3.bf16.msra.mxu0 %v2158_v39  ;;  %2033 = vmatpush3.bf16.msra.mxu1 %v2159_v40 }
  0xd3   : > { %2016 = vmatprep.subr.bf16.mxu0 %v2222_v48  ;;  %2034 = vmatprep.subr.bf16.mxu1 %v2222_v48 }
  0xd6   : > { %2017 = vmatpush3.bf16.msra.mxu0 %v2160_v41  ;;  %2035 = vmatpush3.bf16.msra.mxu1 %v2161_v42 }
  0xd7   : > { %2018 = vmatprep.subr.bf16.mxu0 %v2222_v48  ;;  %2036 = vmatprep.subr.bf16.mxu1 %v2222_v48 }
  0xda   : > { %2019 = vmatpush3.bf16.msra.mxu0 %v2162_v43  ;;  %2037 = vmatpush3.bf16.msra.mxu1 %v2163_v44 }
  0xdb   : > { %2020 = vmatprep.subr.bf16.mxu0 %v2222_v48  ;;  %2038 = vmatprep.subr.bf16.mxu1 %v2222_v48 }
  0xde   : > { %2021 = vmatpush3.bf16.msra.mxu0 %v2164_v45  ;;  %2039 = vmatpush3.bf16.msra.mxu1 %v2165_v46 }
  0xe1   : > { %2023 = vmatmul.mubr.msk.bf16.vlgmr.msra.gmra.mxu0 %vm761_vm1, %v2597_v4  ;;  %2041 = vmatmul.mubr.msk.bf16.vlgmr.msra.gmra.mxu1 %vm761_vm1, %v2597_v4 }
  0xec   : > { %v1511_v19 = vpop.permute.xlu0 %1510  ;;  %v1525_v24 = vpop.permute.xlu1 %1524 }
  0xf0   : > { %v1516_v33 = vpop.permute.xlu0 %1515  ;;  %v1530_v36 = vpop.permute.xlu1 %1529 }
 0x14d   : > { %v799_v47 = vpop.f32.mrf.mxu0  ;;  %v897_v49 = vpop.f32.mrf.mxu1 }
 0x14e   : > { %v904_v50 = vmax.f32 %v799_v47, %v897_v49 }
 0x14f   : > { %v1916_v51 = vpop.f32.mrf.mxu0  ;;  %v1934_v52 = vpop.f32.mrf.mxu1 }
 0x151   : > { %v802_v53 = vpop.f32.mrf.mxu0  ;;  %v900_v54 = vpop.f32.mrf.mxu1 }
 0x152   : > { %v905_v55 = vmax.f32 %v802_v53, %v900_v54 }
 0x153   : > { %v1917_v56 = vpop.f32.mrf.mxu0  ;;  %v1935_v57 = vpop.f32.mrf.mxu1 }
 0x169   : > { %v997_v58 = vpop.f32.mrf.mxu0  ;;  %v1097_v48 = vpop.f32.mrf.mxu1 }
 0x16a   : > { %v1004_v9 = vmax.f32 %v904_v50, %v997_v58 }
 0x16b   : > { %v1952_v59 = vpop.f32.mrf.mxu0  ;;  %v1970_v60 = vpop.f32.mrf.mxu1 }
 0x16c   : > { %v1104_v10 = vmax.f32 %v1004_v9, %v1097_v48 }
 0x16d   : > { %v1000_v61 = vpop.f32.mrf.mxu0  ;;  %v1100_v62 = vpop.f32.mrf.mxu1 }
 0x16e   : > { %v1005_v11 = vmax.f32 %v905_v55, %v1000_v61 }
 0x16f   : > { %v1953_v63 = vpop.f32.mrf.mxu0  ;;  %v1971_v0 = vpop.f32.mrf.mxu1 }
 0x170   : > { %v1105_v13 = vmax.f32 %v1005_v11, %v1100_v62 }
 0x185   : > { %v1197_v1 = vpop.f32.mrf.mxu0  ;;  %v1297_v2 = vpop.f32.mrf.mxu1 }
 0x186   : > { %v1204_v12 = vmax.f32 %v1104_v10, %v1197_v1 }
 0x187   : > { %v1988_v3 = vpop.f32.mrf.mxu0  ;;  %v2006_v4 = vpop.f32.mrf.mxu1 }
 0x188   : > { %v1304_v14 = vmax.f32 %v1204_v12, %v1297_v2 }
 0x189   : > { %v1200_v5 = vpop.f32.mrf.mxu0  ;;  %v1300_v6 = vpop.f32.mrf.mxu1 }
 0x18a   : > { %v1205_v15 = vmax.f32 %v1105_v13, %v1200_v5 }
 0x18b   : > { %v1989_v7 = vpop.f32.mrf.mxu0  ;;  %v2007_v8 = vpop.f32.mrf.mxu1 }
 0x18c   : > { %v1305_v21 = vmax.f32 %v1205_v15, %v1300_v6 }
 0x1a1   : > { %v1397_v16 = vpop.f32.mrf.mxu0  ;;  %v1497_v18 = vpop.f32.mrf.mxu1 }
 0x1a2   : > { %v1404_v17 = vmax.f32 %v1304_v14, %v1397_v16 }
 0x1a3   : > { %v2024_v20 = vpop.f32.mrf.mxu0  ;;  %v2042_v23 = vpop.f32.mrf.mxu1 }
 0x1a4   : > { %v1504_v22 = vmax.f32 %v1404_v17, %v1497_v18 }
 0x1a5   : > { %v1400_v25 = vpop.f32.mrf.mxu0  ;;  %v1500_v28 = vpop.f32.mrf.mxu1 }
 0x1a6   : > { %v1518_v26 = vmul.f32 %v1511_v19, %v1504_v22  ;;  %v1405_v27 = vmax.f32 %v1305_v21, %v1400_v25 }
 0x1a7   : > { %v2025_v29 = vpop.f32.mrf.mxu0  ;;  %v2043_v32 = vpop.f32.mrf.mxu1 }
 0x1a8   : > { %v1532_v30 = vadd.f32 %v1525_v24, %v1518_v26  ;;  %v1505_v31 = vmax.f32 %v1405_v27, %v1500_v28 }
 0x1aa   : > { %vm1534_vm2 = vcmp.gt.f32.partialorder %v1532_v30, 0.0  ;;  %v1536_v34 = vmul.f32 0.01, %v1532_v30  ;;  %v1519_v35 = vmul.f32 %v1516_v33, %v1505_v31 }
 0x1ac   : > { %v1538_v37 = vsel %vm1534_vm2, %v1532_v30, %v1536_v34  ;;  %v1533_v38 = vadd.f32 %v1530_v36, %v1519_v35 }
 0x1ad   : > { %1540 = vst [vmem:[%s696_s13] sm:$0xff] %v1538_v37  ;;  %1548 = sbr.rel (!%p2298_p6) target bundleno = 442 (0x1ba), region = 81 }
 0x1ae   : > { %vm1535_vm3 = vcmp.gt.f32.partialorder %v1533_v38, 0.0  ;;  %v1537_v39 = vmul.f32 0.01, %v1533_v38 }
 0x1b0   : > { %v1539_v40 = vsel %vm1535_vm3, %v1533_v38, %v1537_v39 }
 0x1b1   : > { %1541 = vst [vmem:[%s696_s13 + $0x8] sm:$0xff] %v1539_v40 }
 0x1b4   : > { %v1583_v41 = vld [vmem:[%s696_s13] sm:$0xff] }
 0x1b5   : > { %1584 = vst [vmem:[%s1552_s28] sm:$0xff] %v1583_v41 }
 0x1b8   : > { %v1585_v42 = vld [vmem:[%s696_s13 + $0x8] sm:$0xff] }
 0x1b9   : > { %1586 = vst [vmem:[%s1552_s28 + $0x18] sm:$0xff] %v1585_v42 }
 0x1ba PF: > { %s14_s21 = sadd.s32 1, %s2220_s21   ;;  %s2747_s15 = smov %s2200_s16 }
 0x1bb   : > { %p11_p12 = scmp.ge.s32.totalorder %s14_s21, 8   ;;  %s2748_s16 = smov %s2306_s30 }
 0x1bc   : > { %s2749_s17 = smov %s2212_s19  ;;  %s2750_s18 = smov %s2216_s20 }
 0x1bd   : > { %s2751_s19 = smov %s2754_s22  ;;  %s2752_s20 = smov %s2758_s23 }
 0x1be   :  { %13 = sbr.rel (!%p11_p12) target bundleno = 4 (0x4), region = 157 }

</bundles_post_ra>
